<compile_context>
chip_gen: v6e
topology: v6e:2x2x1
jax: 0.10.0
libtpu: 0.0.40
codegen_flags: <defaults>
</compile_context>

<pallas_src>
import jax
import jax.numpy as jnp
from jax import lax
from jax.experimental import pallas as pl
from jax.experimental.pallas import tpu as pltpu


def generate_vocabs(inp: str):
    # Faithful re-implementation of the reference helper (including its quirky
    # {index: token} result); only its length matters for the forward pass.
    buffer = []
    to_filter = {',', '.', ';', ':', '"', '!'}
    for cha in inp:
        if cha not in to_filter:
            buffer.append(cha)
    filter_out = ''.join(buffer)
    token_list = [token.lower() for token in filter_out.split(' ')]
    token_list.sort()
    return {token: index for token, index in enumerate(token_list)}


def _round_up(a: int, b: int) -> int:
    return ((a + b - 1) // b) * b


def _embed_onehot_kernel(idx_ref, table_ref, out_ref):
    # idx_ref:   VMEM (tile, 1)          int32 — this tile's token indices
    # table_ref: VMEM (vocab_pad, D)     f32   — full embedding table, resident
    # out_ref:   VMEM (tile, D)          f32   — gathered embeddings
    tile = out_ref.shape[0]
    vocab_pad = table_ref.shape[0]

    idx = idx_ref[...]                                           # (tile, 1)
    iota = lax.broadcasted_iota(jnp.int32, (tile, vocab_pad), 1)  # lanes = vocab
    onehot = (iota == idx).astype(table_ref.dtype)               # (tile, vocab_pad)

    # Tiny-K matmul on the MXU: (tile, vocab_pad) @ (vocab_pad, D).
    out_ref[...] = jnp.dot(
        onehot, table_ref[...], preferred_element_type=jnp.float32
    ).astype(out_ref.dtype)


def embedding_forward(sequence: jax.Array, lookup: jax.Array, *, max_tile: int = 512):
    """Pallas equivalent of `Embedding.forward`: lookup[sequence]."""
    vocab, d_model = lookup.shape
    seq_shape = sequence.shape

    flat_idx = sequence.reshape(-1).astype(jnp.int32)
    # Guard against OOB VMEM reads (no runtime bounds checks in the kernel).
    flat_idx = jnp.clip(flat_idx, 0, vocab - 1)
    n = flat_idx.shape[0]

    # Position tile: large (512) for HBM-roofline writeback, but never more
    # than the (sublane-rounded) sequence itself.
    tile = min(max_tile, _round_up(n, 8))
    n_pad = _round_up(n, tile)
    if n_pad != n:                                   # only pad when misaligned
        flat_idx = jnp.pad(flat_idx, (0, n_pad - n))
    idx_col = flat_idx.reshape(n_pad, 1)             # (tile,1) blocks per step

    # Pad the vocab axis to a sublane multiple so the resident table block is
    # cleanly (8,128)-tiled (cheap, tiny table; skipped when already aligned).
    vocab_pad = _round_up(vocab, 8)
    table = lookup if vocab_pad == vocab else jnp.pad(
        lookup, ((0, vocab_pad - vocab), (0, 0)))

    itemsize = jnp.dtype(lookup.dtype).itemsize
    cost = pl.CostEstimate(
        flops=2 * n_pad * vocab_pad * d_model,       # one-hot MXU matmul
        transcendentals=0,
        bytes_accessed=(n_pad * 4                     # indices
                        + vocab_pad * d_model * itemsize   # table (read once)
                        + n_pad * d_model * itemsize),     # output writeback
    )

    out = pl.pallas_call(
        _embed_onehot_kernel,
        out_shape=jax.ShapeDtypeStruct((n_pad, d_model), lookup.dtype),
        grid_spec=pltpu.PrefetchScalarGridSpec(
            num_scalar_prefetch=0,
            grid=(n_pad // tile,),
            in_specs=[
                # Per-step index column (lane dim = 1 == full array dim).
                pl.BlockSpec((tile, 1), lambda i: (i, 0)),
                # Full (tiny) table resident in VMEM across all grid steps.
                pl.BlockSpec((vocab_pad, d_model), lambda i: (0, 0)),
            ],
            out_specs=pl.BlockSpec((tile, d_model), lambda i: (i, 0)),
        ),
        compiler_params=pltpu.CompilerParams(
            dimension_semantics=("parallel",),
        ),
        cost_estimate=cost,
    )(idx_col, table)

    if n_pad != n:                                   # only slice when padded
        out = out[:n]
    return out.reshape(*seq_shape, d_model)


if __name__ == "__main__":
    # Deterministic parameter / input construction (mirrors the torch module).
    rs = "the quick brown fox jumps over the lazy dog"
    d_model = 128
    vocabs = generate_vocabs(rs)
    vocab_size = len(vocabs)            # == len(self.vocabs) in the module

    key = jax.random.PRNGKey(0)
    k_table, k_seq = jax.random.split(key)
    lookup = jax.random.uniform(k_table, (vocab_size, d_model), dtype=jnp.float32)

    batch, seq_len = 2, 8
    sequence = jax.random.randint(k_seq, (batch, seq_len), 0, vocab_size, dtype=jnp.int32)

    out = embedding_forward(sequence, lookup)
    out = jax.block_until_ready(out)

    # Reference check: plain JAX gather (== torch lookup[sequence]).
    ref = lookup[sequence]
    assert out.shape == (batch, seq_len, d_model)
    assert jnp.allclose(out, ref, atol=0.0), "mismatch vs reference gather"

    print("KERNEL_OK")
</pallas_src>

<mosaic_0001>
module attributes {stable_mosaic.version = 11 : i64} {
  func.func @_embed_onehot_kernel(%arg0: i32, %arg1: memref<16x1xi32, #tpu.memory_space<vmem>>, %arg2: memref<16x128xf32, #tpu.memory_space<vmem>>, %arg3: memref<16x128xf32, #tpu.memory_space<vmem>>) attributes {dimension_semantics = [#tpu.dimension_semantics<parallel>], iteration_bounds = array<i64: 1>, scalar_prefetch = 0 : i64, scratch_operands = 0 : i64, tpu.core_type = #tpu.core_type<tc>, window_params = [{transform_indices = @transform_0, window_bounds = array<i64: 16, 1>}, {pipeline_mode = #tpu.pipeline_mode<synchronous>, transform_indices = @transform_1, window_bounds = array<i64: 16, 128>}, {transform_indices = @transform_2, window_bounds = array<i64: 16, 128>}]} {
    %c0 = arith.constant 0 : index
    %c0_0 = arith.constant 0 : index
    %0 = vector.load %arg1[%c0, %c0_0] : memref<16x1xi32, #tpu.memory_space<vmem>>, vector<16x1xi32>
    %1 = tpu.iota {dimensions = array<i32: 1>} : vector<16x16xi32>
    %2 = vector.broadcast %0 : vector<16x1xi32> to vector<16x16xi32>
    %3 = arith.cmpi eq, %1, %2 : vector<16x16xi32>
    %4 = arith.extui %3 : vector<16x16xi1> to vector<16x16xi32>
    %5 = arith.sitofp %4 : vector<16x16xi32> to vector<16x16xf32>
    %c0_1 = arith.constant 0 : index
    %c0_2 = arith.constant 0 : index
    %6 = vector.load %arg2[%c0_1, %c0_2] : memref<16x128xf32, #tpu.memory_space<vmem>>, vector<16x128xf32>
    %cst = arith.constant dense<0.000000e+00> : vector<16x128xf32>
    %7 = tpu.matmul %5, %6, %cst {dimension_numbers = #tpu.dot_dimension_numbers<[1], [0], [0], [1], [0, 0, 1, 1], [], []>} : vector<16x16xf32>, vector<16x128xf32>, vector<16x128xf32> -> vector<16x128xf32>
    %c0_3 = arith.constant 0 : index
    %c0_4 = arith.constant 0 : index
    %8 = vector.load %arg3[%c0_3, %c0_4] : memref<16x128xf32, #tpu.memory_space<vmem>>, vector<16x128xf32>
    tpu.vector_store %arg3[%c0_3, %c0_4], %7 {strides = array<i32>} : memref<16x128xf32, #tpu.memory_space<vmem>>, vector<16x128xf32>,
    return
  }
  func.func @transform_0(%arg0: i32) -> (i32, i32) {
    %c0_i32 = arith.constant 0 : i32
    %c0_i32_0 = arith.constant 0 : i32
    return %arg0, %c0_i32 : i32, i32
  }
  func.func @transform_1(%arg0: i32) -> (i32, i32) {
    %c0_i32 = arith.constant 0 : i32
    %c0_i32_0 = arith.constant 0 : i32
    %c0_i32_1 = arith.constant 0 : i32
    return %c0_i32, %c0_i32_0 : i32, i32
  }
  func.func @transform_2(%arg0: i32) -> (i32, i32) {
    %c0_i32 = arith.constant 0 : i32
    %c0_i32_0 = arith.constant 0 : i32
    return %arg0, %c0_i32 : i32, i32
  }
}

</mosaic_0001>

<bundles_post_ra>
// kernel: tpu_custom_call.1
= control target key start
LH: loop header
LB: loop body
LE: loop exit
PB: predicated region body
PF: predicated region fallthrough
CT: control target
= control target key end

     0   :  { %v173_v2 = vmov 0   ;;  %s208_s0 = inlined_call_operand.vmem [shape: s32[16,1], index: 0, kind: input, shape index: {}]   ;;  %s209_s1 = inlined_call_operand.vmem [shape: f32[16,128], index: 1, kind: input, shape index: {}]   ;;  %s210_s2 = inlined_call_operand.hbm [shape: f32[16,128], index: 2, kind: output, shape index: {}]  }
   0x1   :  { %v12_v0 = vld [vmem:[%s208_s0] sm:$0xff]  ;;  %v29_v1 = vld [vmem:[%s209_s1 + $0x8] sm:$0xff]  ;;  %150 = vset.pattern.permute.xlu0 %v173_v2 }
   0x2   :  { %138 = vmatprep.subr.mxu0 %v29_v1  ;;  %v28_v3 = vld [vmem:[%s209_s1] sm:$0xff] }
   0x3   :  { %7 = vsyncpa [#allocation3], 0  ;;  %17 = vperm.xlu0 %150, %v12_v0   ;;  %139 = vmatpush3.msra.mxu0 %v29_v1  ;;  %v13_v4 = vld [vmem:[%s208_s0 + $0x8] sm:$0xff]  ;;  %v14_v5 = vlaneseq  ;;  %vm30_vm0 = vcmask 130048   ;;  %v174_v8 = vmov 0.0   ;;  %s175_s1 = smov [#allocation2]  }
   0x4   :  { %140 = vmatprep.subr.mxu0 %v28_v3  ;;  %s119_s17 = sshll.u32 %s175_s1, 4  ;;  %s120_s17 = int_to_ptr.vmem [resolvable:$true] %s119_s17 }
   0x5   :  { %141 = vmatpush3.msra.mxu0 %v28_v3  ;;  %v15_v6 = vand.u32 127, %v14_v5  ;;  %s151_s0 = scalar_lea.vmem %s120_s17, 256  ;;  %p156_p1 = scmp.lt.s32.totalorder %s120_s17, %s120_s17 }
   0x6   :  { %p152_p0 = scmp.ne.s32.totalorder %s120_s17, %s151_s0  ;;  %p157_p2 = scmp.lt.s32.totalorder %s151_s0, %s151_s0 }
   0x7   :  { %20 = vperm.xlu0 %150, %v13_v4  }
   0x8   :  { %p158_p3 = por %p157_p2, %p156_p1 }
   0xa   :  { %p159_p4 = pnand %p158_p3, %p152_p0 }
  0x7e   :  { %v18_v7 = vpop.permute.xlu0 %17 }
  0x7f   :  { %vm22_vm1 = vcmp.eq.s32.totalorder %v15_v6, %v18_v7 }
  0x80   :  { %v130_v9 = vsel %vm22_vm1, 1.0, %v174_v8 }
  0x81   :  { %142 = vmatprep.mubr.msk.f32.mxu0 %vm30_vm0, %v130_v9 }
  0x82   :  { %v21_v10 = vpop.permute.xlu0 %20 }
  0x83   :  { %vm23_vm2 = vcmp.eq.s32.totalorder %v15_v6, %v21_v10 }
  0x84   :  { %v131_v11 = vsel %vm23_vm2, 1.0, %v174_v8 }
  0x85   :  { %143 = vmatmul.mubr.msk.f32.vlgmr.msra.gmra.mxu0 %vm30_vm0, %v131_v11 }
 0x145   :  { %v144_v12 = vpop.f32.mrf.mxu0 }
 0x146   :  { %113 = vst [vmem:[#allocation2 + $0x8] sm:$0xff] %v144_v12 }
 0x147   :  { %v103_v13 = vpop.f32.mrf.mxu0 }
 0x148   :  { %112 = vst [vmem:[#allocation2] sm:$0xff] %v103_v13 }
 0x149   :  { %162 = shalt.err (!%p159_p4)
}
 0x14a   :  { %s176_s18 = smov 128   ;;  %s177_s19 = smov 8  }
 0x14b   :  { %125 = dma.vmem_to_hbm [thread:$0]  %s120_s17, 256, %s210_s2, [#allocation3], %s176_s18, %s176_s18, %s177_s19  }
 0x14c   :  { %171 = dma.done.wait [#allocation3], 256  }
 0x14d   :  { %172 = vsyncadd [#allocation3], 4294967040 }
 0x14e   :  { %129 = vsyncpa [#allocation3], 1 }

</bundles_post_ra>
